<compile_context>
chip_gen: v6e
topology: v6e:2x2x1
jax: 0.10.0
libtpu: 0.0.40
codegen_flags: <defaults>
</compile_context>

<pallas_src>
import jax
import jax.numpy as jnp
from jax.experimental import pallas as pl
from jax.experimental.pallas import tpu as pltpu


def _round_up(v, m):
    return (v + m - 1) // m * m


def rnn_cell_kernel(x_ref, h_ref, wih_ref, whh_ref, b_ref, out_ref):
    # x: (B, I)  h: (B, H)  wih: (I, tn)  whh: (H, tn)  b: (1, tn)  out: (B, tn)
    cdt = wih_ref.dtype  # matmul operand dtype (f32 or bf16); cast is a no-op for f32
    x = x_ref[...].astype(cdt)
    h = h_ref[...].astype(cdt)
    acc = jnp.dot(x, wih_ref[...], preferred_element_type=jnp.float32)
    acc = acc + jnp.dot(h, whh_ref[...], preferred_element_type=jnp.float32)
    # Epilogue stays in f32 (bias kept f32): safe on v5e (no bf16 VPU/EUP).
    out_ref[...] = jnp.tanh(acc + b_ref[...]).astype(out_ref.dtype)


def prepare_rnn_cell_params(W_ih, W_hh, bias_ih, bias_hh, *, compute_dtype=jnp.float32):
    """Static, call ONCE (at parameter init / outside any scan): transpose,
    pad the output (N) dim to a lane-dense multiple, fold + pad the biases."""
    H, I = W_ih.shape
    assert W_hh.shape == (H, H)

    quantum = 256 if H >= 256 else 128        # 256-wide MXU on v6e/v7x; 128 on v5e / tiny H
    tn = min(_round_up(H, quantum), 512)      # N tile; keeps double-buffered blocks tiny vs. v7x VMEM
    Hp = _round_up(H, tn)                     # padded N so the grid divides evenly

    Wih_T = W_ih.T.astype(compute_dtype)      # (I, H)  K-major: no in-kernel transpose
    Whh_T = W_hh.T.astype(compute_dtype)      # (H, H)
    bias = (bias_ih + bias_hh).astype(jnp.float32).reshape(1, H)  # folded, f32 epilogue

    if Hp != H:
        Wih_p = jnp.zeros((I, Hp), compute_dtype).at[:, :H].set(Wih_T)
        Whh_p = jnp.zeros((H, Hp), compute_dtype).at[:, :H].set(Whh_T)
        bias_p = jnp.zeros((1, Hp), jnp.float32).at[:, :H].set(bias)
    else:  # fast path: already lane-aligned, no padding copies at all
        Wih_p, Whh_p, bias_p = Wih_T, Whh_T, bias

    return dict(Wih_p=Wih_p, Whh_p=Whh_p, bias_p=bias_p,
                I=I, H=H, Hp=Hp, tn=tn, compute_dtype=compute_dtype)


def custom_rnn_cell(x, hidden, params):
    """Single RNN-cell step. `params` comes from prepare_rnn_cell_params (hoisted)."""
    B, I = x.shape
    H, Hp, tn = params["H"], params["Hp"], params["tn"]
    assert I == params["I"] and hidden.shape == (B, H)

    Wih_p, Whh_p, bias_p = params["Wih_p"], params["Whh_p"], params["bias_p"]
    w_isz = jnp.dtype(params["compute_dtype"]).itemsize
    a_isz = jnp.dtype(x.dtype).itemsize
    out_dtype = x.dtype
    o_isz = jnp.dtype(out_dtype).itemsize

    grid_n = Hp // tn

    # Explicit VMEM budget with headroom (v7x physical VMEM is only 64 MiB).
    block_bytes = (
        2 * ((I + H) * tn * w_isz + tn * 4 + B * tn * o_isz)   # double-buffered weight/bias/out tiles
        + 2 * (B * I + B * H) * a_isz                          # resident activation blocks
    )
    vmem_limit = int(min(max(block_bytes + (4 << 20), 8 << 20), 100 << 20))

    cost = pl.CostEstimate(
        flops=2 * B * (I + H) * Hp,
        transcendentals=B * Hp,
        bytes_accessed=int((B * I + B * H) * a_isz
                           + (I + H) * Hp * w_isz + Hp * 4 + B * Hp * o_isz),
    )

    out_p = pl.pallas_call(
        rnn_cell_kernel,
        out_shape=jax.ShapeDtypeStruct((B, Hp), out_dtype),
        grid_spec=pltpu.PrefetchScalarGridSpec(
            num_scalar_prefetch=0,
            grid=(grid_n,),
            in_specs=[
                pl.BlockSpec((B, I), lambda j: (0, 0)),    # x, resident across N tiles
                pl.BlockSpec((B, H), lambda j: (0, 0)),    # hidden, resident
                pl.BlockSpec((I, tn), lambda j: (0, j)),   # W_ih.T tile (K-major)
                pl.BlockSpec((H, tn), lambda j: (0, j)),   # W_hh.T tile (K-major)
                pl.BlockSpec((1, tn), lambda j: (0, j)),   # folded bias tile (f32)
            ],
            out_specs=pl.BlockSpec((B, tn), lambda j: (0, j)),  # lane-dense (tn % 128 == 0)
        ),
        compiler_params=pltpu.CompilerParams(
            dimension_semantics=("parallel",),
            vmem_limit_bytes=vmem_limit,
        ),
        cost_estimate=cost,
    )(x, hidden, Wih_p, Whh_p, bias_p)

    # Only slice when padding was actually applied (fast path skips the copy).
    return out_p if Hp == H else out_p[:, :H]


if __name__ == "__main__":
    # Small shapes consistent with the module's single-step forward.
    B, I, H = 8, 16, 32

    key = jax.random.PRNGKey(0)
    kx, kh, kwih, kwhh, kbih, kbhh = jax.random.split(key, 6)

    x = jax.random.normal(kx, (B, I), dtype=jnp.float32)
    hidden = jax.random.normal(kh, (B, H), dtype=jnp.float32)

    # Deterministic parameter init (module uses randn for all params).
    W_ih = jax.random.normal(kwih, (H, I), dtype=jnp.float32)
    W_hh = jax.random.normal(kwhh, (H, H), dtype=jnp.float32)
    bias_ih = jax.random.normal(kbih, (H,), dtype=jnp.float32)
    bias_hh = jax.random.normal(kbhh, (H,), dtype=jnp.float32)

    # Reference (plain JAX, module math).
    ref = jnp.tanh(x @ W_ih.T + bias_ih + hidden @ W_hh.T + bias_hh)

    # ---- f32 path: matches the module numerics ----
    params_f32 = prepare_rnn_cell_params(W_ih, W_hh, bias_ih, bias_hh)  # hoisted: once
    out = jax.block_until_ready(custom_rnn_cell(x, hidden, params_f32))
    assert out.shape == (B, H)
    assert jnp.allclose(out, ref, atol=1e-4, rtol=1e-4), "f32 mismatch vs reference"

    # ---- bf16-matmul path (v6e/v7x fast path): bf16 operands, f32 accumulate/epilogue ----
    params_bf16 = prepare_rnn_cell_params(
        W_ih, W_hh, bias_ih, bias_hh, compute_dtype=jnp.bfloat16)
    out_bf16 = jax.block_until_ready(custom_rnn_cell(x, hidden, params_bf16))
    assert out_bf16.shape == (B, H)
    assert jnp.allclose(out_bf16, ref, atol=5e-2, rtol=5e-2), "bf16 mismatch vs reference"

    print("KERNEL_OK")
</pallas_src>

<mosaic_0001>
module attributes {stable_mosaic.version = 11 : i64} {
  func.func @rnn_cell_kernel(%arg0: i32, %arg1: memref<8x16xf32, #tpu.memory_space<vmem>>, %arg2: memref<8x32xf32, #tpu.memory_space<vmem>>, %arg3: memref<16x128xf32, #tpu.memory_space<vmem>>, %arg4: memref<32x128xf32, #tpu.memory_space<vmem>>, %arg5: memref<1x128xf32, #tpu.memory_space<vmem>>, %arg6: memref<8x128xf32, #tpu.memory_space<vmem>>) attributes {dimension_semantics = [#tpu.dimension_semantics<parallel>], iteration_bounds = array<i64: 1>, scalar_prefetch = 0 : i64, scratch_operands = 0 : i64, tpu.core_type = #tpu.core_type<tc>, window_params = [{pipeline_mode = #tpu.pipeline_mode<synchronous>, transform_indices = @transform_0, window_bounds = array<i64: 8, 16>}, {pipeline_mode = #tpu.pipeline_mode<synchronous>, transform_indices = @transform_1, window_bounds = array<i64: 8, 32>}, {transform_indices = @transform_2, window_bounds = array<i64: 16, 128>}, {transform_indices = @transform_3, window_bounds = array<i64: 32, 128>}, {transform_indices = @transform_4, window_bounds = array<i64: 1, 128>}, {transform_indices = @transform_5, window_bounds = array<i64: 8, 128>}]} {
    %c0 = arith.constant 0 : index
    %c0_0 = arith.constant 0 : index
    %0 = vector.load %arg1[%c0, %c0_0] : memref<8x16xf32, #tpu.memory_space<vmem>>, vector<8x16xf32>
    %c0_1 = arith.constant 0 : index
    %c0_2 = arith.constant 0 : index
    %1 = vector.load %arg2[%c0_1, %c0_2] : memref<8x32xf32, #tpu.memory_space<vmem>>, vector<8x32xf32>
    %c0_3 = arith.constant 0 : index
    %c0_4 = arith.constant 0 : index
    %2 = vector.load %arg3[%c0_3, %c0_4] : memref<16x128xf32, #tpu.memory_space<vmem>>, vector<16x128xf32>
    %cst = arith.constant dense<0.000000e+00> : vector<8x128xf32>
    %3 = tpu.matmul %0, %2, %cst {dimension_numbers = #tpu.dot_dimension_numbers<[1], [0], [0], [1], [0, 0, 1, 1], [], []>} : vector<8x16xf32>, vector<16x128xf32>, vector<8x128xf32> -> vector<8x128xf32>
    %c0_5 = arith.constant 0 : index
    %c0_6 = arith.constant 0 : index
    %4 = vector.load %arg4[%c0_5, %c0_6] : memref<32x128xf32, #tpu.memory_space<vmem>>, vector<32x128xf32>
    %cst_7 = arith.constant dense<0.000000e+00> : vector<8x128xf32>
    %5 = tpu.matmul %1, %4, %cst_7 {dimension_numbers = #tpu.dot_dimension_numbers<[1], [0], [0], [1], [0, 0, 1, 1], [], []>} : vector<8x32xf32>, vector<32x128xf32>, vector<8x128xf32> -> vector<8x128xf32>
    %6 = arith.addf %3, %5 : vector<8x128xf32>
    %c0_8 = arith.constant 0 : index
    %c0_9 = arith.constant 0 : index
    %7 = vector.load %arg5[%c0_8, %c0_9] : memref<1x128xf32, #tpu.memory_space<vmem>>, vector<1x128xf32>
    %8 = vector.broadcast %7 : vector<1x128xf32> to vector<8x128xf32>
    %9 = arith.addf %6, %8 : vector<8x128xf32>
    %10 = math.tanh %9 : vector<8x128xf32>
    %c0_10 = arith.constant 0 : index
    %c0_11 = arith.constant 0 : index
    %11 = vector.load %arg6[%c0_10, %c0_11] : memref<8x128xf32, #tpu.memory_space<vmem>>, vector<8x128xf32>
    tpu.vector_store %arg6[%c0_10, %c0_11], %10 {strides = array<i32>} : memref<8x128xf32, #tpu.memory_space<vmem>>, vector<8x128xf32>,
    return
  }
  func.func @transform_0(%arg0: i32) -> (i32, i32) {
    %c0_i32 = arith.constant 0 : i32
    %c0_i32_0 = arith.constant 0 : i32
    %c0_i32_1 = arith.constant 0 : i32
    return %c0_i32, %c0_i32_0 : i32, i32
  }
  func.func @transform_1(%arg0: i32) -> (i32, i32) {
    %c0_i32 = arith.constant 0 : i32
    %c0_i32_0 = arith.constant 0 : i32
    %c0_i32_1 = arith.constant 0 : i32
    return %c0_i32, %c0_i32_0 : i32, i32
  }
  func.func @transform_2(%arg0: i32) -> (i32, i32) {
    %c0_i32 = arith.constant 0 : i32
    %c0_i32_0 = arith.constant 0 : i32
    return %c0_i32, %arg0 : i32, i32
  }
  func.func @transform_3(%arg0: i32) -> (i32, i32) {
    %c0_i32 = arith.constant 0 : i32
    %c0_i32_0 = arith.constant 0 : i32
    return %c0_i32, %arg0 : i32, i32
  }
  func.func @transform_4(%arg0: i32) -> (i32, i32) {
    %c0_i32 = arith.constant 0 : i32
    %c0_i32_0 = arith.constant 0 : i32
    return %c0_i32, %arg0 : i32, i32
  }
  func.func @transform_5(%arg0: i32) -> (i32, i32) {
    %c0_i32 = arith.constant 0 : i32
    %c0_i32_0 = arith.constant 0 : i32
    return %c0_i32, %arg0 : i32, i32
  }
}

</mosaic_0001>

<bundles_post_ra>
// kernel: tpu_custom_call.1
= control target key start
LH: loop header
LB: loop body
LE: loop exit
PB: predicated region body
PF: predicated region fallthrough
CT: control target
= control target key end

     0   :  { %10 = vsyncpa [#allocation3], 0  ;;  %s460_s0 = inlined_call_operand.hbm [shape: f32[8,16], index: 0, kind: input, shape index: {}]   ;;  %s461_s1 = inlined_call_operand.hbm [shape: f32[8,32], index: 1, kind: input, shape index: {}]   ;;  %s462_s2 = inlined_call_operand.hbm [shape: f32[16,128], index: 2, kind: input, shape index: {}]   ;;  %s463_s3 = inlined_call_operand.hbm [shape: f32[32,128], index: 3, kind: input, shape index: {}]   ;;  %s464_s4 = inlined_call_operand.vmem [shape: f32[1,128], index: 4, kind: input, shape index: {}]   ;;  %s465_s5 = inlined_call_operand.hbm [shape: f32[8,128], index: 5, kind: output, shape index: {}]  }
   0x1   :  { %11 = vsyncpa [#allocation6], 0 }
   0x2   :  { %12 = vsyncpa [#allocation9], 0 }
   0x3   :  { %13 = vsyncpa [#allocation4], 0  ;;  %s403_s18 = smov [#allocation5]   ;;  %s404_s20 = smov [#allocation2]  }
   0x4   :  { %s30_s19 = sshll.u32 %s403_s18, 4  ;;  %s20_s21 = sshll.u32 %s404_s20, 4  ;;  %s31_s19 = int_to_ptr.vmem [resolvable:$true] %s30_s19  ;;  %s21_s21 = int_to_ptr.vmem [resolvable:$true] %s20_s21 }
   0x5   :  { %s303_s22 = scalar_lea.vmem %s31_s19, 128  ;;  %p308_p1 = scmp.lt.s32.totalorder %s31_s19, %s31_s19 }
   0x6   :  { %p304_p0 = scmp.ne.s32.totalorder %s31_s19, %s303_s22  ;;  %p309_p2 = scmp.lt.s32.totalorder %s303_s22, %s303_s22 }
   0x8   :  { %p310_p3 = por %p309_p2, %p308_p1 }
   0xa   :  { %p311_p4 = pnand %p310_p3, %p304_p0 }
   0xc   :  { %314 = shalt.err (!%p311_p4)
}
   0xd   :  { %33 = dma.hbm_to_vmem [thread:$0]  %s461_s1, 128, %s31_s19, [#allocation6]  }
   0xe   :  { %s323_s25 = scalar_lea.vmem %s21_s21, 128  ;;  %p328_p6 = scmp.lt.s32.totalorder %s21_s21, %s21_s21 }
   0xf   :  { %p324_p5 = scmp.ne.s32.totalorder %s21_s21, %s323_s25  ;;  %p329_p7 = scmp.lt.s32.totalorder %s323_s25, %s323_s25 }
  0x11   :  { %p330_p8 = por %p329_p7, %p328_p6 }
  0x13   :  { %p331_p9 = pnand %p330_p8, %p324_p5 }
  0x15   :  { %334 = shalt.err (!%p331_p9)
}
  0x16   :  { %23 = dma.hbm_to_vmem [thread:$0]  %s460_s0, 128, %s21_s21, [#allocation3]  }
  0x17   :  { %s405_s28 = smov [#allocation7]  }
  0x18   :  { %s39_s29 = sshll.u32 %s405_s28, 4  ;;  %s40_s29 = int_to_ptr.vmem [resolvable:$true] %s39_s29 }
  0x19   :  { %s343_s30 = scalar_lea.vmem %s40_s29, 256  ;;  %p348_p11 = scmp.lt.s32.totalorder %s40_s29, %s40_s29 }
  0x1a   :  { %p344_p10 = scmp.ne.s32.totalorder %s40_s29, %s343_s30  ;;  %p349_p12 = scmp.lt.s32.totalorder %s343_s30, %s343_s30 }
  0x1c   :  { %p350_p13 = por %p349_p12, %p348_p11 }
  0x1e   :  { %p351_p0 = pnand %p350_p13, %p344_p10 }
  0x20   :  { %354 = shalt.err (!%p351_p0)
}
  0x21   :  { %s406_s1 = smov 128   ;;  %s407_s6 = smov 8  }
  0x22   :  { %45 = dma.hbm_to_vmem [thread:$0]  %s462_s2, 256, %s40_s29, [#allocation6], %s406_s1, %s406_s1, %s407_s6  }
  0x23   :  { %s408_s9 = smov [#allocation8]  }
  0x24   :  { %s51_s10 = sshll.u32 %s408_s9, 4  ;;  %s52_s10 = int_to_ptr.vmem [resolvable:$true] %s51_s10 }
  0x25   :  { %s363_s0 = scalar_lea.vmem %s52_s10, 512  ;;  %p368_p2 = scmp.lt.s32.totalorder %s52_s10, %s52_s10 }
  0x26   :  { %p364_p1 = scmp.ne.s32.totalorder %s52_s10, %s363_s0  ;;  %p369_p3 = scmp.lt.s32.totalorder %s363_s0, %s363_s0 }
  0x28   :  { %p370_p4 = por %p369_p3, %p368_p2 }
  0x2a   :  { %p371_p5 = pnand %p370_p4, %p364_p1 }
  0x2c   :  { %374 = shalt.err (!%p371_p5)
}
  0x2d   :  { %57 = dma.hbm_to_vmem [thread:$0]  %s463_s3, 512, %s52_s10, [#allocation9], %s406_s1, %s406_s1, %s407_s6  }
  0x2e   :  { %395 = dma.done.wait [#allocation3], 128  }
  0x2f   :  { %396 = vsyncadd [#allocation3], 4294967168 }
  0x30   :  { %397 = dma.done.wait [#allocation6], 384  }
  0x31   :  { %398 = vsyncadd [#allocation6], 4294966912 }
  0x32   :  { %399 = dma.done.wait [#allocation9], 512  }
  0x33   :  { %400 = vsyncadd [#allocation9], 4294966784  ;;  %v409_v0 = vmov 0.0   ;;  %vm410_vm0 = vmmov 0   ;;  %v79_v1 = vld [vmem:[#allocation8 + $0x18] sm:$0xff]  ;;  %v78_v2 = vld [vmem:[#allocation8 + $0x10] sm:$0xff] }
  0x34   :  { %266 = vmatprep.subr.mxu0 %v409_v0  ;;  %277 = vmatprep.subr.mxu1 %v409_v0  ;;  %v75_v3 = vld [vmem:[#allocation7 + $0x8] sm:$0xff]  ;;  %v74_v4 = vld [vmem:[#allocation7] sm:$0xff]  ;;  %v72_v5 = vld [vmem:[#allocation2] sm:$0xff]  ;;  %vm154_vm1 = vcmask 130048   ;;  %vm80_vm2 = vcmask 261120   ;;  %s411_s13 = smov [#allocation10]  }
  0x35   :  { %281 = vmatprep.mubr.msk.f32.mxu1 %vm410_vm0, %v409_v0  ;;  %274 = vmatprep.mubr.msk.f32.mxu0 %vm410_vm0, %v409_v0  ;;  %v77_v6 = vld [vmem:[#allocation8 + $0x8] sm:$0xff]  ;;  %v76_v7 = vld [vmem:[#allocation8] sm:$0xff]  ;;  %s244_s14 = sshll.u32 %s411_s13, 4  ;;  %s245_s14 = int_to_ptr.vmem [resolvable:$true] %s244_s14 }
  0x36   :  { %267 = vmatpush3.msra.mxu0 %v79_v1  ;;  %278 = vmatpush3.msra.mxu1 %v75_v3  ;;  %v73_v8 = vld [vmem:[#allocation5] sm:$0xff]  ;;  %v257_v12 = vld [vmem:[%s464_s4] ss:$0 sm:$0xff]  ;;  %s375_s15 = scalar_lea.vmem %s245_s14, 128  ;;  %p380_p7 = scmp.lt.s32.totalorder %s245_s14, %s245_s14 }
  0x37   :  { %268 = vmatprep.subr.mxu0 %v409_v0  ;;  %279 = vmatprep.subr.mxu1 %v409_v0  ;;  %p376_p6 = scmp.ne.s32.totalorder %s245_s14, %s375_s15  ;;  %p381_p8 = scmp.lt.s32.totalorder %s375_s15, %s375_s15 }
  0x38   :  { %269 = vmatpush3.msra.mxu0 %v78_v2  ;;  %280 = vmatpush3.msra.mxu1 %v74_v4 }
  0x39   :  { %270 = vmatprep.subr.mxu0 %v409_v0  ;;  %282 = vmatmul.mubr.msk.f32.vlgmr.msra.gmra.mxu1 %vm154_vm1, %v72_v5  ;;  %p382_p9 = por %p381_p8, %p380_p7 }
  0x3a   :  { %271 = vmatpush3.msra.mxu0 %v77_v6 }
  0x3b   :  { %272 = vmatprep.subr.mxu0 %v409_v0  ;;  %p383_p10 = pnand %p382_p9, %p376_p6 }
  0x3c   :  { %273 = vmatpush3.msra.mxu0 %v76_v7 }
  0x3d   :  { %275 = vmatmul.mubr.msk.f32.vlgmr.msra.gmra.mxu0 %vm80_vm2, %v73_v8 }
  0xf9   :  { %v224_v9 = vpop.f32.mrf.mxu1 }
  0xfb   :  { %v283_v10 = vpop.f32.mrf.mxu1 }
  0xfd   :  { %v150_v11 = vpop.f32.mrf.mxu0 }
  0xfe   :  { %v225_v13 = vadd.f32 %v224_v9, %v150_v11 }
  0xff   :  { %v276_v14 = vpop.f32.mrf.mxu0 }
 0x100   :  { %v235_v15 = vadd.f32 %v257_v12, %v225_v13 }
 0x102   :  { %293 = vtanh.f32 %v235_v15 }
 0x10f   :  { %v294_v16 = vpop.eup %293 }
 0x110   :  { %237 = vst [vmem:[#allocation10] sm:$0xff] %v294_v16 }
 0x111   :  { %386 = shalt.err (!%p383_p10)
}
 0x112   :  { %247 = dma.vmem_to_hbm [thread:$0]  %s245_s14, 128, %s465_s5, [#allocation4]  }
 0x113   :  { %401 = dma.done.wait [#allocation4], 128  }
 0x114   :  { %402 = vsyncadd [#allocation4], 4294967168 }
 0x115   :  { %251 = vsyncpa [#allocation3], 1 }
 0x116   :  { %252 = vsyncpa [#allocation6], 1 }
 0x117   :  { %253 = vsyncpa [#allocation9], 1 }
 0x118   :  { %254 = vsyncpa [#allocation4], 1 }

</bundles_post_ra>
